<compile_context>
chip_gen: v6e
topology: v6e:2x2x1
jax: 0.10.0
libtpu: 0.0.40
codegen_flags: <defaults>
</compile_context>

<pallas_src>
import functools

import jax
import jax.numpy as jnp
from jax.experimental import pallas as pl
from jax.experimental.pallas import tpu as pltpu


D_HID1, D_HID2, D_OUT = 150, 50, 4


# ----------------------------------------------------------------------------
# Pallas kernel: full MLP hot path for one batch tile (feature-major layout)
# ----------------------------------------------------------------------------
def _make_kernel(n_cat_cols, k_cat):
    """k_cat = total one-hot rows = sum of categorical cardinalities."""

    def kernel(nc_ref, cat_ref, w1nc_ref, lut_ref, w2_ref, b2_ref,
               wh_ref, bh_ref, o_ref):
        tb = nc_ref.shape[1]

        # Combined one-hot (k_cat, tb).  Ids were pre-shifted per column in the
        # wrapper so every categorical column owns a disjoint row range; a
        # single lane-dense compare per column builds the whole thing.
        # NOTE: out-of-range ids silently contribute zero (unlike torch).
        rows = jax.lax.broadcasted_iota(jnp.int32, (k_cat, tb), 0)
        ids = cat_ref[...]                                  # (J, tb) int32
        hit = rows == ids[0:1, :]
        for j in range(1, n_cat_cols):
            hit = jnp.logical_or(hit, rows == ids[j:j + 1, :])
        onehot = hit.astype(w1nc_ref.dtype)                 # (k_cat, tb) bf16

        # lin1 (BN + bias already folded into w1nc / LUT): two MXU passes.
        h1 = jnp.dot(w1nc_ref[...], nc_ref[...],
                     preferred_element_type=jnp.float32)
        h1 = h1 + jnp.dot(lut_ref[...], onehot,
                          preferred_element_type=jnp.float32)
        h1 = jnp.maximum(h1, 0.0)                           # (150, tb) f32

        # lin2 (BN folded) -> relu
        h2 = jnp.dot(w2_ref[...], h1.astype(w2_ref.dtype),
                     preferred_element_type=jnp.float32)
        h2 = jnp.maximum(h2 + b2_ref[...], 0.0)             # (50, tb) f32

        # head -> sigmoid; (4, tb) store is lane-dense along the batch axis.
        logits = jnp.dot(wh_ref[...], h2.astype(wh_ref.dtype),
                         preferred_element_type=jnp.float32)
        o_ref[...] = jax.nn.sigmoid(logits + bh_ref[...])

    return kernel


# ----------------------------------------------------------------------------
# Wrapper: BN folding, embedding->LUT folding, batch grid, pallas_call
# ----------------------------------------------------------------------------
def dsb_ovr_forward(non_cat, cat, params, *, block_b=8192, target_steps=4):
    """non_cat: (B, n_non_cat) float, cat: (B, n_cat_cols) int -> (B, 4) f32.

    block_b: max batch tile (rows).  Default 8192 keeps in-kernel intermediates
    (~10 MiB) inside the 32 MiB scoped VMEM we request on every generation.
    target_steps: tile is capped so the grid keeps >= target_steps steps when B
    is large (v7x megacore split needs >= 2 steps on the "parallel" axis).
    """
    B, n_nc = non_cat.shape
    n_cat_cols = cat.shape[1]
    emb_tables = params["emb_tables"]
    assert n_cat_cols == len(emb_tables)

    # ---- Fold eval-mode BatchNorm into the Linear weights / biases ----
    eps = 1e-5
    s1 = params["bn1_gamma"] * jax.lax.rsqrt(params["bn1_var"] + eps)
    t1 = params["bn1_beta"] - params["bn1_mean"] * s1
    s2 = params["bn2_gamma"] * jax.lax.rsqrt(params["bn2_var"] + eps)
    t2 = params["bn2_beta"] - params["bn2_mean"] * s2
    w1f = params["w1"] * s1[None, :]
    b1f = params["b1"] * s1 + t1
    w2f = params["w2"] * s2[None, :]
    b2f = params["b2"] * s2 + t2

    # ---- Fold embedding tables into one feature-major LUT over W1 ----
    # concat order is [non_cat, emb_0, ..., emb_{J-1}]  (matches the module).
    # TODO(synk): for large categorical vocabularies (cardinality >> 1k) the
    # onehot @ LUT rewrite should switch to a scalar-prefetch DMA gather of
    # embedding rows; all cardinalities for this module are tiny.
    w1nc_b = w1f[:n_nc].T.astype(jnp.bfloat16)               # (150, n_nc)
    luts_t, cards = [], []
    off = n_nc
    for tbl in emb_tables:
        card, d = tbl.shape
        luts_t.append((tbl.astype(jnp.float32) @ w1f[off:off + d]).T)  # (150, card)
        cards.append(int(card))
        off += d
    lut_all = jnp.concatenate(luts_t, axis=1)                # (150, sum(card))
    # Each example selects exactly one row of categorical column 0, so folding
    # the (BN-folded) lin1 bias into that LUT block adds it exactly once.
    lut_all = lut_all.at[:, :cards[0]].add(b1f[:, None])
    lut_all = lut_all.astype(jnp.bfloat16)
    k_cat = sum(cards)

    w2b = w2f.T.astype(jnp.bfloat16)                         # (50, 150)
    whb = params["wh"].T.astype(jnp.bfloat16)                # (4, 50)
    b2c = b2f.reshape(-1, 1).astype(jnp.float32)             # (50, 1)
    bhc = params["bh"].reshape(-1, 1).astype(jnp.float32)    # (4, 1)

    # Per-column row offsets so one combined one-hot covers all columns.
    offs, acc = [], 0
    for c in cards:
        offs.append(acc)
        acc += c
    offs = jnp.asarray(offs, jnp.int32)

    # ---- Batch tiling: lane-dense -> tb is a multiple of 128 ----
    tb = min(int(block_b), max(128, -(-B // int(target_steps))))
    tb = ((tb + 127) // 128) * 128
    nb = pl.cdiv(B, tb)
    Bp = nb * tb
    pad = Bp - B

    nc_t = non_cat.astype(jnp.bfloat16).T                    # (n_nc, B) bf16
    cat_t = (cat.astype(jnp.int32) + offs[None, :]).T        # (J, B) i32
    if pad:
        nc_t = jnp.pad(nc_t, ((0, 0), (0, pad)))
        cat_t = jnp.pad(cat_t, ((0, 0), (0, pad)))

    stream = lambda rows: pl.BlockSpec((rows, tb), lambda i: (0, i))
    resident = lambda shape: pl.BlockSpec(shape, lambda i: (0, 0))

    in_specs = [
        stream(n_nc),            # non_cat tile, (n_nc, tb) bf16, lane-dense
        stream(n_cat_cols),      # shifted ids,  (J, tb) i32,  lane-dense
        resident(w1nc_b.shape),
        resident(lut_all.shape),
        resident(w2b.shape),
        resident(b2c.shape),
        resident(whb.shape),
        resident(bhc.shape),
    ]
    out_specs = pl.BlockSpec((D_OUT, tb), lambda i: (0, i))

    # Advisory cost estimate: kernel is small-compute / streaming.
    flops = 2 * Bp * (n_nc * D_HID1 + k_cat * D_HID1
                      + D_HID1 * D_HID2 + D_HID2 * D_OUT)
    weight_bytes = sum(int(a.size) * a.dtype.itemsize
                       for a in (w1nc_b, lut_all, w2b, b2c, whb, bhc))
    bytes_accessed = int(Bp * (n_nc * 2 + n_cat_cols * 4 + D_OUT * 4)
                         + weight_bytes)

    out_t = pl.pallas_call(
        _make_kernel(n_cat_cols, k_cat),
        out_shape=jax.ShapeDtypeStruct((D_OUT, Bp), jnp.float32),
        grid=(nb,),
        in_specs=in_specs,
        out_specs=out_specs,
        compiler_params=pltpu.CompilerParams(
            dimension_semantics=("parallel",),
            vmem_limit_bytes=32 * 1024 * 1024),
        cost_estimate=pl.CostEstimate(
            flops=flops, transcendentals=Bp * D_OUT,
            bytes_accessed=bytes_accessed),
    )(nc_t, cat_t, w1nc_b, lut_all, w2b, b2c, whb, bhc)

    # (4, Bp) feature-major output -> (B, 4); transpose is a cheap XLA op.
    return out_t[:, :B].T


# ----------------------------------------------------------------------------
# Pure-JAX reference (f32, mirrors the PyTorch eval-mode forward)
# ----------------------------------------------------------------------------
def reference_forward(non_cat, cat, params):
    eps = 1e-5
    embs = [params["emb_tables"][j][cat[:, j]]
            for j in range(len(params["emb_tables"]))]
    x = jnp.concatenate([non_cat] + embs, axis=1).astype(jnp.float32)

    def bn(y, name):
        g, b = params[f"{name}_gamma"], params[f"{name}_beta"]
        m, v = params[f"{name}_mean"], params[f"{name}_var"]
        return g * (y - m) / jnp.sqrt(v + eps) + b

    h1 = jax.nn.relu(bn(x @ params["w1"] + params["b1"], "bn1"))
    h2 = jax.nn.relu(bn(h1 @ params["w2"] + params["b2"], "bn2"))
    return jax.nn.sigmoid(h2 @ params["wh"] + params["bh"])


# ----------------------------------------------------------------------------
# Deterministic parameter construction (synthetic weights, no checkpoint load)
# ----------------------------------------------------------------------------
def init_params(key, cat_dims, n_non_categorical):
    n_emb_out = sum(y for _, y in cat_dims)
    d_in = n_non_categorical + n_emb_out

    keys = iter(jax.random.split(key, 32))
    nxt = lambda: next(keys)

    def linear(kin, kout):
        lim = 1.0 / jnp.sqrt(kin)
        w = jax.random.uniform(nxt(), (kin, kout), jnp.float32, -lim, lim)
        b = jax.random.uniform(nxt(), (kout,), jnp.float32, -lim, lim)
        return w, b

    params = {}
    params["emb_tables"] = [
        jax.random.normal(nxt(), (n, d), jnp.float32) for n, d in cat_dims
    ]
    params["w1"], params["b1"] = linear(d_in, D_HID1)
    params["w2"], params["b2"] = linear(D_HID1, D_HID2)
    params["wh"], params["bh"] = linear(D_HID2, D_OUT)

    for name, n in (("bn1", D_HID1), ("bn2", D_HID2)):
        params[f"{name}_gamma"] = 1.0 + 0.1 * jax.random.normal(nxt(), (n,), jnp.float32)
        params[f"{name}_beta"] = 0.1 * jax.random.normal(nxt(), (n,), jnp.float32)
        params[f"{name}_mean"] = 0.05 * jax.random.normal(nxt(), (n,), jnp.float32)
        params[f"{name}_var"] = 0.5 + jax.random.uniform(nxt(), (n,), jnp.float32)
    return params


# ----------------------------------------------------------------------------
if __name__ == "__main__":
    key = jax.random.PRNGKey(0)
    k_param, k_nc, k_cat = jax.random.split(key, 3)

    cat_dims = [(5, 3), (7, 2), (4, 4)]   # (cardinality, emb_dim) per cat column
    n_non_categorical = 4
    B = 200                                # not a tile multiple: exercises padding

    params = init_params(k_param, cat_dims, n_non_categorical)

    non_cat = jax.random.normal(k_nc, (B, n_non_categorical), jnp.float32)
    cat = jnp.stack(
        [jax.random.randint(jax.random.fold_in(k_cat, j), (B,), 0, n)
         for j, (n, _) in enumerate(cat_dims)],
        axis=1,
    ).astype(jnp.int32)

    # Small batch tile for the demo so the pipelined grid has multiple steps.
    fwd = jax.jit(functools.partial(dsb_ovr_forward, params=params, block_b=128))
    out = fwd(non_cat, cat)
    jax.block_until_ready(out)

    ref = reference_forward(non_cat, cat, params)

    assert out.shape == (B, 4)
    assert bool(jnp.all(jnp.isfinite(out)))
    assert bool(jnp.all((out >= 0.0) & (out <= 1.0)))
    max_err = float(jnp.max(jnp.abs(out - ref)))
    assert max_err < 3e-2, f"max abs err vs reference: {max_err}"
    print("KERNEL_OK")
</pallas_src>

<mosaic_0001>
module attributes {stable_mosaic.version = 11 : i64} {
  func.func @kernel(%arg0: i32, %arg1: memref<4x128xbf16, #tpu.memory_space<vmem>>, %arg2: memref<3x128xi32, #tpu.memory_space<vmem>>, %arg3: memref<150x4xbf16, #tpu.memory_space<vmem>>, %arg4: memref<150x16xbf16, #tpu.memory_space<vmem>>, %arg5: memref<50x150xbf16, #tpu.memory_space<vmem>>, %arg6: memref<50x1xf32, #tpu.memory_space<vmem>>, %arg7: memref<4x50xbf16, #tpu.memory_space<vmem>>, %arg8: memref<4x1xf32, #tpu.memory_space<vmem>>, %arg9: memref<4x128xf32, #tpu.memory_space<vmem>>) attributes {dimension_semantics = [#tpu.dimension_semantics<parallel>], iteration_bounds = array<i64: 2>, scalar_prefetch = 0 : i64, scratch_operands = 0 : i64, tpu.core_type = #tpu.core_type<tc>, window_params = [{transform_indices = @transform_0, window_bounds = array<i64: 4, 128>}, {transform_indices = @transform_1, window_bounds = array<i64: 3, 128>}, {pipeline_mode = #tpu.pipeline_mode<synchronous>, transform_indices = @transform_2, window_bounds = array<i64: 150, 4>}, {pipeline_mode = #tpu.pipeline_mode<synchronous>, transform_indices = @transform_3, window_bounds = array<i64: 150, 16>}, {pipeline_mode = #tpu.pipeline_mode<synchronous>, transform_indices = @transform_4, window_bounds = array<i64: 50, 150>}, {pipeline_mode = #tpu.pipeline_mode<synchronous>, transform_indices = @transform_5, window_bounds = array<i64: 50, 1>}, {pipeline_mode = #tpu.pipeline_mode<synchronous>, transform_indices = @transform_6, window_bounds = array<i64: 4, 50>}, {pipeline_mode = #tpu.pipeline_mode<synchronous>, transform_indices = @transform_7, window_bounds = array<i64: 4, 1>}, {transform_indices = @transform_8, window_bounds = array<i64: 4, 128>}]} {
    %0 = tpu.iota {dimensions = array<i32: 0>} : vector<16x128xi32>
    %c0 = arith.constant 0 : index
    %c0_0 = arith.constant 0 : index
    %1 = vector.load %arg2[%c0, %c0_0] : memref<3x128xi32, #tpu.memory_space<vmem>>, vector<3x128xi32>
    %2 = vector.extract_strided_slice %1 {offsets = [0, 0], sizes = [1, 128], strides = [1, 1]} : vector<3x128xi32> to vector<1x128xi32>
    %3 = vector.broadcast %2 : vector<1x128xi32> to vector<16x128xi32>
    %4 = arith.cmpi eq, %0, %3 : vector<16x128xi32>
    %5 = vector.extract_strided_slice %1 {offsets = [1, 0], sizes = [1, 128], strides = [1, 1]} : vector<3x128xi32> to vector<1x128xi32>
    %6 = vector.broadcast %5 : vector<1x128xi32> to vector<16x128xi32>
    %7 = arith.cmpi eq, %0, %6 : vector<16x128xi32>
    %8 = arith.ori %4, %7 : vector<16x128xi1>
    %9 = vector.extract_strided_slice %1 {offsets = [2, 0], sizes = [1, 128], strides = [1, 1]} : vector<3x128xi32> to vector<1x128xi32>
    %10 = vector.broadcast %9 : vector<1x128xi32> to vector<16x128xi32>
    %11 = arith.cmpi eq, %0, %10 : vector<16x128xi32>
    %12 = arith.ori %8, %11 : vector<16x128xi1>
    %13 = arith.extui %12 : vector<16x128xi1> to vector<16x128xi32>
    %14 = arith.sitofp %13 : vector<16x128xi32> to vector<16x128xf32>
    %15 = arith.truncf %14 : vector<16x128xf32> to vector<16x128xbf16>
    %c0_1 = arith.constant 0 : index
    %c0_2 = arith.constant 0 : index
    %16 = vector.load %arg3[%c0_1, %c0_2] : memref<150x4xbf16, #tpu.memory_space<vmem>>, vector<150x4xbf16>
    %c0_3 = arith.constant 0 : index
    %c0_4 = arith.constant 0 : index
    %17 = vector.load %arg1[%c0_3, %c0_4] : memref<4x128xbf16, #tpu.memory_space<vmem>>, vector<4x128xbf16>
    %cst = arith.constant dense<0.000000e+00> : vector<150x128xf32>
    %18 = tpu.matmul %16, %17, %cst {dimension_numbers = #tpu.dot_dimension_numbers<[1], [0], [0], [1], [0, 0, 1, 1], [], []>} : vector<150x4xbf16>, vector<4x128xbf16>, vector<150x128xf32> -> vector<150x128xf32>
    %c0_5 = arith.constant 0 : index
    %c0_6 = arith.constant 0 : index
    %19 = vector.load %arg4[%c0_5, %c0_6] : memref<150x16xbf16, #tpu.memory_space<vmem>>, vector<150x16xbf16>
    %cst_7 = arith.constant dense<0.000000e+00> : vector<150x128xf32>
    %20 = tpu.matmul %19, %15, %cst_7 {dimension_numbers = #tpu.dot_dimension_numbers<[1], [0], [0], [1], [0, 0, 1, 1], [], []>} : vector<150x16xbf16>, vector<16x128xbf16>, vector<150x128xf32> -> vector<150x128xf32>
    %21 = arith.addf %18, %20 : vector<150x128xf32>
    %cst_8 = arith.constant 0.000000e+00 : f32
    %22 = vector.broadcast %cst_8 : f32 to vector<150x128xf32>
    %23 = arith.maximumf %21, %22 : vector<150x128xf32>
    %c0_9 = arith.constant 0 : index
    %c0_10 = arith.constant 0 : index
    %24 = vector.load %arg5[%c0_9, %c0_10] : memref<50x150xbf16, #tpu.memory_space<vmem>>, vector<50x150xbf16>
    %25 = arith.truncf %23 : vector<150x128xf32> to vector<150x128xbf16>
    %cst_11 = arith.constant dense<0.000000e+00> : vector<50x128xf32>
    %26 = tpu.matmul %24, %25, %cst_11 {dimension_numbers = #tpu.dot_dimension_numbers<[1], [0], [0], [1], [0, 0, 1, 1], [], []>} : vector<50x150xbf16>, vector<150x128xbf16>, vector<50x128xf32> -> vector<50x128xf32>
    %c0_12 = arith.constant 0 : index
    %c0_13 = arith.constant 0 : index
    %27 = vector.load %arg6[%c0_12, %c0_13] : memref<50x1xf32, #tpu.memory_space<vmem>>, vector<50x1xf32>
    %28 = vector.broadcast %27 : vector<50x1xf32> to vector<50x128xf32>
    %29 = arith.addf %26, %28 : vector<50x128xf32>
    %cst_14 = arith.constant 0.000000e+00 : f32
    %30 = vector.broadcast %cst_14 : f32 to vector<50x128xf32>
    %31 = arith.maximumf %29, %30 : vector<50x128xf32>
    %c0_15 = arith.constant 0 : index
    %c0_16 = arith.constant 0 : index
    %32 = vector.load %arg7[%c0_15, %c0_16] : memref<4x50xbf16, #tpu.memory_space<vmem>>, vector<4x50xbf16>
    %33 = arith.truncf %31 : vector<50x128xf32> to vector<50x128xbf16>
    %cst_17 = arith.constant dense<0.000000e+00> : vector<4x128xf32>
    %34 = tpu.matmul %32, %33, %cst_17 {dimension_numbers = #tpu.dot_dimension_numbers<[1], [0], [0], [1], [0, 0, 1, 1], [], []>} : vector<4x50xbf16>, vector<50x128xbf16>, vector<4x128xf32> -> vector<4x128xf32>
    %c0_18 = arith.constant 0 : index
    %c0_19 = arith.constant 0 : index
    %35 = vector.load %arg8[%c0_18, %c0_19] : memref<4x1xf32, #tpu.memory_space<vmem>>, vector<4x1xf32>
    %36 = vector.broadcast %35 : vector<4x1xf32> to vector<4x128xf32>
    %37 = arith.addf %34, %36 : vector<4x128xf32>
    %38 = arith.negf %37 : vector<4x128xf32>
    %39 = math.exp %38 : vector<4x128xf32>
    %cst_20 = arith.constant 1.000000e+00 : f32
    %40 = vector.broadcast %cst_20 : f32 to vector<4x128xf32>
    %41 = arith.addf %40, %39 : vector<4x128xf32>
    %42 = arith.divf %40, %41 : vector<4x128xf32>
    %c0_21 = arith.constant 0 : index
    %c0_22 = arith.constant 0 : index
    %43 = vector.load %arg9[%c0_21, %c0_22] : memref<4x128xf32, #tpu.memory_space<vmem>>, vector<4x128xf32>
    tpu.vector_store %arg9[%c0_21, %c0_22], %42 {strides = array<i32>} : memref<4x128xf32, #tpu.memory_space<vmem>>, vector<4x128xf32>,
    return
  }
  func.func @transform_0(%arg0: i32) -> (i32, i32) {
    %c0_i32 = arith.constant 0 : i32
    %c0_i32_0 = arith.constant 0 : i32
    return %c0_i32, %arg0 : i32, i32
  }
  func.func @transform_1(%arg0: i32) -> (i32, i32) {
    %c0_i32 = arith.constant 0 : i32
    %c0_i32_0 = arith.constant 0 : i32
    return %c0_i32, %arg0 : i32, i32
  }
  func.func @transform_2(%arg0: i32) -> (i32, i32) {
    %c0_i32 = arith.constant 0 : i32
    %c0_i32_0 = arith.constant 0 : i32
    %c0_i32_1 = arith.constant 0 : i32
    return %c0_i32, %c0_i32_0 : i32, i32
  }
  func.func @transform_3(%arg0: i32) -> (i32, i32) {
    %c0_i32 = arith.constant 0 : i32
    %c0_i32_0 = arith.constant 0 : i32
    %c0_i32_1 = arith.constant 0 : i32
    return %c0_i32, %c0_i32_0 : i32, i32
  }
  func.func @transform_4(%arg0: i32) -> (i32, i32) {
    %c0_i32 = arith.constant 0 : i32
    %c0_i32_0 = arith.constant 0 : i32
    %c0_i32_1 = arith.constant 0 : i32
    return %c0_i32, %c0_i32_0 : i32, i32
  }
  func.func @transform_5(%arg0: i32) -> (i32, i32) {
    %c0_i32 = arith.constant 0 : i32
    %c0_i32_0 = arith.constant 0 : i32
    %c0_i32_1 = arith.constant 0 : i32
    return %c0_i32, %c0_i32_0 : i32, i32
  }
  func.func @transform_6(%arg0: i32) -> (i32, i32) {
    %c0_i32 = arith.constant 0 : i32
    %c0_i32_0 = arith.constant 0 : i32
    %c0_i32_1 = arith.constant 0 : i32
    return %c0_i32, %c0_i32_0 : i32, i32
  }
  func.func @transform_7(%arg0: i32) -> (i32, i32) {
    %c0_i32 = arith.constant 0 : i32
    %c0_i32_0 = arith.constant 0 : i32
    %c0_i32_1 = arith.constant 0 : i32
    return %c0_i32, %c0_i32_0 : i32, i32
  }
  func.func @transform_8(%arg0: i32) -> (i32, i32) {
    %c0_i32 = arith.constant 0 : i32
    %c0_i32_0 = arith.constant 0 : i32
    return %c0_i32, %arg0 : i32, i32
  }
}

</mosaic_0001>

<bundles_post_ra>
// kernel: dsb_ovr_forward.1
= control target key start
LH: loop header
LB: loop body
LE: loop exit
PB: predicated region body
PF: predicated region fallthrough
CT: control target
= control target key end

     0   :  { %s1363_s27 = smov 0   ;;  %s1562_s0 = inlined_call_operand.vmem [shape: bf16[4,256], index: 0, kind: input, shape index: {}]   ;;  %s1563_s1 = inlined_call_operand.vmem [shape: s32[3,256], index: 1, kind: input, shape index: {}]   ;;  %s1564_s2 = inlined_call_operand.vmem [shape: bf16[150,4], index: 2, kind: input, shape index: {}]   ;;  %s1565_s3 = inlined_call_operand.vmem [shape: bf16[150,16], index: 3, kind: input, shape index: {}]   ;;  %s1566_s4 = inlined_call_operand.vmem [shape: bf16[50,150], index: 4, kind: input, shape index: {}]   ;;  %s1567_s5 = inlined_call_operand.vmem [shape: f32[50,1], index: 5, kind: input, shape index: {}]   ;;  %s1568_s6 = inlined_call_operand.vmem [shape: bf16[4,50], index: 6, kind: input, shape index: {}]   ;;  %s1569_s7 = inlined_call_operand.vmem [shape: f32[4,1], index: 7, kind: input, shape index: {}]   ;;  %s1570_s8 = inlined_call_operand.vmem [shape: f32[4,256], index: 8, kind: output, shape index: {}]  }
   0x1 LB: > { %s1105_s28 = sadd.s32 4294967295, %s1312_s27   ;;  %p1109_p0 = scmp.ge.s32.totalorder %s1312_s27, 1  ;;  %s1312_s27 = sphi %s1363_s27, %s18_s27  }
   0x2   : > { %p270_p1 = scmp.lt.s32.totalorder %s1312_s27, 3 }
   0x4   : > { %p271_p2 = pnand %p1109_p0, %p270_p1 }
   0x5   : > { %p306_p3 = scmp.lt.s32.totalorder (!%p271_p2), %s1105_s28, 1 }
   0x6   : > { %274 = sbr.rel (%p271_p2) target bundleno = 762 (0x2fa), region = 52 }
   0xb   : > { %v319_v0 = vlaneseq  ;;  %v1271_v1 = vld [vmem:[%s1564_s2] sm:$0xff]   ;;  %vm628_vm0 = vcmask 31744   ;;  %s1572_s28 = smov (!%p306_p3, %s1105_s28), 1  ;;  %vm659_vm1 = vcmask 1041408   ;;  %vm437_vm2 = vcmask 130048   ;;  %v1272_v11 = vld [vmem:[%s1564_s2 + $0x8] sm:$0xff]  }
   0xc   : > { %v1273_v3 = vld [vmem:[%s1565_s3] sm:$0xff]   ;;  %1224 = vmatprep.mubr.msk.bf16.mxu1 %vm628_vm0, %v1271_v1  ;;  %s1110_s11 = sshll.u32 %s1572_s28, 1  ;;  %s1111_s12 = sshll.u32 %s1572_s28, 2  ;;  %v1275_v15 = vld [vmem:[%s1564_s2 + $0x10] sm:$0xff]   ;;  %v1274_v16 = vld [vmem:[%s1565_s3 + $0x8] sm:$0xff]   ;;  %v1315_v33 = vmov 0  }
   0xd   : > { %v320_v2 = vshrl.u32 %v319_v0, 7  ;;  %1202 = vmatprep.mubr.msk.bf16.mxu0 %vm437_vm2, %v1273_v3  ;;  %s309_s15 = scalar_lea.vmem %s1562_s0, %s1110_s11  ;;  %s313_s18 = scalar_lea.vmem %s1563_s1, %s1111_s12  ;;  %v1276_v17 = vld [vmem:[%s1564_s2 + $0x18] sm:$0xff]   ;;  %v1314_v18 = vmov 1.0|1.0   ;;  %v1277_v19 = vld [vmem:[%s1565_s3 + $0x10] sm:$0xff]   ;;  %v1279_v20 = vld [vmem:[%s1564_s2 + $0x20] sm:$0xff]   ;;  %1270 = vset.pattern.permute.xlu1 %v1315_v33 }
   0xe   : > { %v322_v8 = vld [vmem:[%s313_s18] sm:$0x7]  ;;  %v1278_v21 = vld [vmem:[%s1565_s3 + $0x18] sm:$0xff]   ;;  %v1280_v22 = vld [vmem:[%s1564_s2 + $0x28] sm:$0xff]   ;;  %1269 = vset.pattern.permute.xlu0 %v1315_v33  ;;  %vm886_vm14 = vcmask 179200   ;;  %vm899_vm15 = vcmask 1042432   ;;  %s317_s13 = scalar_lea.vmem %s1570_s8, %s1111_s12 }
   0xf   : > { %v321_v4 = vadd.s32 8, %v320_v2  ;;  %v325_v5 = vsub.s32 0, %v320_v2  ;;  %v331_v6 = vsub.s32 1, %v320_v2  ;;  %v339_v7 = vsub.s32 2, %v320_v2  ;;  %v369_v9 = vld [vmem:[%s309_s15] sm:$0x3] }
  0x10   : > { %1256 = vmatprep.subr.msk.bf16.mxu1 %vm659_vm1, %v369_v9  ;;  %v661_v10 = vsel %vm659_vm1, %v369_v9, 0  ;;  %v1281_v23 = vld [vmem:[%s1565_s3 + $0x20] sm:$0xff]   ;;  %v1283_v24 = vld [vmem:[%s1564_s2 + $0x30] sm:$0xff]   ;;  %v1282_v25 = vld [vmem:[%s1565_s3 + $0x28] sm:$0xff]   ;;  %vm989_vm1 = vcmask 1040384  }
  0x11   : > { %v326_v12 = vrot.slane %v322_v8, %v325_v5  ;;  %v332_v13 = vrot.slane %v322_v8, %v331_v6  ;;  %v340_v14 = vrot.slane %v322_v8, %v339_v7  ;;  %1223 = vmatpush3.bf16.msra.mxu1 %v661_v10  ;;  %v1284_v26 = vld [vmem:[%s1564_s2 + $0x38] sm:$0xff]   ;;  %v1285_v27 = vld [vmem:[%s1565_s3 + $0x30] sm:$0xff]   ;;  %v1288_v28 = vld [vmem:[%s1564_s2 + $0x40] sm:$0xff]  }
  0x12   : > { %v1286_v29 = vld [vmem:[%s1565_s3 + $0x38] sm:$0xff]   ;;  %v1290_v30 = vld [vmem:[%s1564_s2 + $0x48] ss:$0 sps:$4 sm:$0x77]   ;;  %v1287_v31 = vld [vmem:[%s1565_s3 + $0x40] sm:$0xff]  }
  0x13   : > { %vm327_vm3 = vcmp.eq.s32.totalorder %v320_v2, %v326_v12  ;;  %vm328_vm4 = vcmp.eq.s32.totalorder %v321_v4, %v326_v12  ;;  %vm333_vm5 = vcmp.eq.s32.totalorder %v320_v2, %v332_v13  ;;  %vm334_vm6 = vcmp.eq.s32.totalorder %v321_v4, %v332_v13  ;;  %v1289_v32 = vld [vmem:[%s1565_s3 + $0x48] ss:$0 sps:$4 sm:$0x77]   ;;  %v1293_v34 = vld [vmem:[%s1566_s4 + $0x4] ss:$8 sps:$4 sm:$0xff]   ;;  %v813_v38 = vld [vmem:[%s1567_s5 + $0x10] sm:$0xff] }
  0x14   : > { %vm335_vm7 = vmor %vm327_vm3, %vm333_vm5  ;;  %vm341_vm8 = vcmp.eq.s32.totalorder %v320_v2, %v340_v14  ;;  %vm342_vm9 = vcmp.eq.s32.totalorder %v321_v4, %v340_v14  ;;  %1225 = vmatmul.mubr.msk.bf16.vlgmr.msra.gmra.mxu1 %vm628_vm0, %v1272_v11  ;;  %v817_v35 = vld [vmem:[%s1567_s5 + $0x30] sm:$0x3]  ;;  %v816_v36 = vld [vmem:[%s1567_s5 + $0x28] sm:$0xff] }
  0x15   : > { %vm336_vm10 = vmor %vm328_vm4, %vm334_vm6  ;;  %1228 = vmatprep.mubr.msk.bf16.mxu1 %vm628_vm0, %v1275_v15  ;;  %850 = vperm.xlu0 %1269, %v817_v35   ;;  %v815_v37 = vld [vmem:[%s1567_s5 + $0x20] sm:$0xff]  ;;  %v814_v39 = vld [vmem:[%s1567_s5 + $0x18] sm:$0xff] }
  0x16   : > { %vm343_vm11 = vmor %vm335_vm7, %vm341_vm8  ;;  %845 = vperm.xlu1 %1270, %v816_v36   ;;  %v811_v40 = vld [vmem:[%s1567_s5] sm:$0xff]  ;;  %v812_v41 = vld [vmem:[%s1567_s5 + $0x8] sm:$0xff] }
  0x17   : > { %vm344_vm12 = vmor %vm336_vm10, %vm342_vm9  ;;  %v979_v42 = vld [vmem:[%s1569_s7] sm:$0xf] }
  0x18   : > { %vm1125_vm13 = vmpackc.low %vm344_vm12, %vm343_vm11 }
  0x19   : > { %1200 = vmatprep.subr.msk.bf16.mxu0 %vm1125_vm13, %v1314_v18  ;;  %840 = vperm.xlu0 %1269, %v815_v37  }
  0x1a   : > { %1201 = vmatpush3.bf16.msk.msra.mxu0 %vm1125_vm13, %v1314_v18  ;;  %830 = vperm.xlu1 %1270, %v813_v38  }
  0x1b   : > { %903 = vmatprep.subr.bf16.mxu0 %v1315_v33 }
  0x1c   : > { %1229 = vmatmul.mubr.msk.bf16.gmra.mxu1 %vm628_vm0, %v1276_v17 }
  0x1d   : > { %1203 = vmatmul.mubr.msk.bf16.vlgmr.msra.gmra.mxu0 %vm437_vm2, %v1274_v16  ;;  %1232 = vmatprep.mubr.msk.bf16.mxu1 %vm628_vm0, %v1279_v20 }
  0x1e   : > { %1206 = vmatprep.mubr.msk.bf16.mxu0 %vm437_vm2, %v1277_v19  ;;  %835 = vperm.xlu0 %1269, %v814_v39  }
  0x1f   : > { %820 = vperm.xlu1 %1270, %v811_v40  }
  0x22   : > { %825 = vperm.xlu0 %1269, %v812_v41  }
  0x23   : > { %982 = vperm.xlu1 %1270, %v979_v42  }
  0x24   : > { %1233 = vmatmul.mubr.msk.bf16.gmra.mxu1 %vm628_vm0, %v1280_v22 }
  0x25   : > { %1207 = vmatmul.mubr.msk.bf16.gmra.mxu0 %vm437_vm2, %v1278_v21  ;;  %1236 = vmatprep.mubr.msk.bf16.mxu1 %vm628_vm0, %v1283_v24 }
  0x26   : > { %1210 = vmatprep.mubr.msk.bf16.mxu0 %vm437_vm2, %v1281_v23 }
  0x2c   : > { %1237 = vmatmul.mubr.msk.bf16.gmra.mxu1 %vm628_vm0, %v1284_v26 }
  0x2d   : > { %1211 = vmatmul.mubr.msk.bf16.gmra.mxu0 %vm437_vm2, %v1282_v25  ;;  %1240 = vmatprep.mubr.msk.bf16.mxu1 %vm628_vm0, %v1288_v28 }
  0x2e   : > { %1214 = vmatprep.mubr.msk.bf16.mxu0 %vm437_vm2, %v1285_v27 }
  0x34   : > { %1241 = vmatmul.mubr.msk.bf16.gmra.mxu1 %vm628_vm0, %v1290_v30  ;;  %vm1317_vm0 = vmmov 0  }
  0x35   : > { %1215 = vmatmul.mubr.msk.bf16.gmra.mxu0 %vm437_vm2, %v1286_v29 }
  0x36   : > { %1218 = vmatprep.mubr.msk.bf16.mxu0 %vm437_vm2, %v1287_v31 }
  0x3d   : > { %1219 = vmatmul.mubr.msk.bf16.gmra.mxu0 %vm437_vm2, %v1289_v32  ;;  %vm985_vm2 = vcmask 408576  }
  0x3e   : > { %1165 = vmatprep.mubr.msk.bf16.mxu0 %vm886_vm14, %v1293_v34 }
  0xd4   : > { %v1494_v43 = vpop.f32.mrf.mxu1 }
  0xd6   : > { %v1496_v44 = vpop.f32.mrf.mxu1 }
  0xd8   : > { %v1498_v45 = vpop.f32.mrf.mxu1 }
  0xda   : > { %v1500_v46 = vpop.f32.mrf.mxu1 }
  0xdc   : > { %v1230_v48 = vpop.f32.mrf.mxu1 }
  0xdd   : > { %v1502_v47 = vpop.f32.mrf.mxu0 }
  0xde   : > { %v713_v50 = vpop.f32.mrf.mxu1 }
  0xdf   : > { %v1504_v49 = vpop.f32.mrf.mxu0 }
  0xe0   : > { %v1231_v52 = vpop.f32.mrf.mxu1 }
  0xe1   : > { %v1506_v51 = vpop.f32.mrf.mxu0 }
  0xe2   : > { %v716_v54 = vpop.f32.mrf.mxu1 }
  0xe3   : > { %v1508_v53 = vpop.f32.mrf.mxu0 }
  0xe4   : > { %v1234_v56 = vpop.f32.mrf.mxu1 }
  0xe5   : > { %v1208_v55 = vpop.f32.mrf.mxu0 }
  0xe6   : > { %v729_v58 = vpop.f32.mrf.mxu1  ;;  %v722_v37 = vadd.f32 %v1230_v48, %v1208_v55  ;;  %v706_v48 = vadd.f32 %v1494_v43, %v1502_v47 }
  0xe7   : > { %v518_v57 = vpop.f32.mrf.mxu0 }
  0xe8   : > { %v1235_v60 = vpop.f32.mrf.mxu1  ;;  %v781_v42 = vmax.f32 %v722_v37, 0.0 }
  0xe9   : > { %v1209_v59 = vpop.f32.mrf.mxu0 }
  0xea   : > { %v732_v62 = vpop.f32.mrf.mxu1  ;;  %v725_v34 = vadd.f32 %v1231_v52, %v1209_v59 }
  0xeb   : > { %v521_v61 = vpop.f32.mrf.mxu0 }
  0xec   : > { %v1238_v0 = vpop.f32.mrf.mxu1  ;;  %v782_v39 = vmax.f32 %v725_v34, 0.0  ;;  %v717_v40 = vadd.f32 %v716_v54, %v521_v61  ;;  %v777_v61 = vmax.f32 %v706_v48, 0.0 }
  0xed   : > { %v1212_v63 = vpop.f32.mrf.mxu0 }
  0xee   : > { %v745_v2 = vpop.f32.mrf.mxu1  ;;  %v738_v25 = vadd.f32 %v1234_v56, %v1212_v63  ;;  %v714_v56 = vadd.f32 %v713_v50, %v518_v57  ;;  %v780_v52 = vmax.f32 %v717_v40, 0.0  ;;  %v701_v50 = vadd.f32 %v1500_v46, %v1508_v53 }
  0xef   : > { %v534_v1 = vpop.f32.mrf.mxu0 }
  0xf0   : > { %v1239_v4 = vpop.f32.mrf.mxu1  ;;  %v785_v31 = vmax.f32 %v738_v25, 0.0  ;;  %v730_v32 = vadd.f32 %v729_v58, %v534_v1  ;;  %v709_v58 = vadd.f32 %v1498_v45, %v1506_v51  ;;  %v779_v55 = vmax.f32 %v714_v56, 0.0 }
  0xf1   : > { %v1213_v3 = vpop.f32.mrf.mxu0  ;;  %v776_v43 = vmax.f32 %v701_v50, 0.0 }
  0xf2   : > { %v748_v6 = vpop.f32.mrf.mxu1  ;;  %v741_v21 = vadd.f32 %v1235_v60, %v1213_v3  ;;  %v783_v38 = vmax.f32 %v730_v32, 0.0  ;;  %v804_v60 = vpack.c.bf16 %v782_v39, %v781_v42  ;;  %v778_v54 = vmax.f32 %v709_v58, 0.0 }
  0xf3   : > { %v537_v5 = vpop.f32.mrf.mxu0  ;;  %v803_v57 = vpack.c.bf16 %v780_v52, %v779_v55 }
  0xf4   : > { %v1242_v8 = vpop.f32.mrf.mxu1  ;;  %v786_v28 = vmax.f32 %v741_v21, 0.0  ;;  %v733_v29 = vadd.f32 %v732_v62, %v537_v5  ;;  %v698_v62 = vadd.f32 %v1496_v44, %v1504_v49  ;;  %v802_v51 = vpack.c.bf16 %v778_v54, %v777_v61  ;;  %v1291_v5 = vld [vmem:[%s1566_s4] ss:$8 sps:$4 sm:$0xff]  }
  0xf5   : > { %v1216_v7 = vpop.f32.mrf.mxu0 }
  0xf6   : > { %v1510_v10 = vpop.f32.mrf.mxu1  ;;  %v754_v11 = vadd.f32 %v1238_v0, %v1216_v7  ;;  %v806_v35 = vpack.c.bf16 %v786_v28, %v785_v31  ;;  %v784_v36 = vmax.f32 %v733_v29, 0.0  ;;  %v775_v0 = vmax.f32 %v698_v62, 0.0  ;;  %v1296_v7 = vld [vmem:[%s1566_s4 + $0x10] ss:$8 sps:$4 sm:$0xff]  }
  0xf7   : > { %v550_v9 = vpop.f32.mrf.mxu0 }
  0xf8   : > { %v1243_v13 = vpop.f32.mrf.mxu1  ;;  %v789_v16 = vmax.f32 %v754_v11, 0.0  ;;  %v746_v17 = vadd.f32 %v745_v2, %v550_v9  ;;  %v805_v41 = vpack.c.bf16 %v784_v36, %v783_v38  ;;  %v801_v2 = vpack.c.bf16 %v776_v43, %v775_v0  ;;  %v1299_v9 = vld [vmem:[%s1566_s4 + $0x20] ss:$8 sps:$4 sm:$0xff]  }
  0xf9   : > { %v1217_v12 = vpop.f32.mrf.mxu0 }
  0xfa   : > { %v757_v14 = vadd.f32 %v1239_v4, %v1217_v12  ;;  %v787_v26 = vmax.f32 %v746_v17, 0.0  ;;  %v764_v63 = vpop.f32.mrf.mxu1  ;;  %v1316_v12 = vmov 0.0  }
  0xfb   : > { %v553_v15 = vpop.f32.mrf.mxu0  ;;  %1244 = vmatprep.subr.bf16.mxu1 %v1316_v12  ;;  %1252 = vmatprep.mubr.msk.bf16.mxu1 %vm1317_vm0, %v1316_v12 }
  0xfc   : > { %v790_v18 = vmax.f32 %v757_v14, 0.0  ;;  %v749_v19 = vadd.f32 %v748_v6, %v553_v15  ;;  %v1294_v6 = vld [vmem:[%s1566_s4 + $0x14] ss:$8 sps:$4 sm:$0xff]  }
  0xfd   : > { %v1220_v20 = vpop.f32.mrf.mxu0 }
  0xfe   : > { %v808_v22 = vpack.c.bf16 %v790_v18, %v789_v16  ;;  %v788_v23 = vmax.f32 %v749_v19, 0.0  ;;  %v770_v59 = vadd.f32 %v1242_v8, %v1220_v20  ;;  %v800_v8 = vld [vmem:[%s1566_s4 + $0x30] sm:$0x11]  ;;  %v851_v20 = vpop.permute.xlu0 %850 }
  0xff   : > { %v566_v24 = vpop.f32.mrf.mxu0  ;;  %v1163_v11 = vcombine.low %v800_v8, %v800_v8 }
 0x100   : > { %904 = vmatpush1.bf16.msra.mxu0 %v808_v22  ;;  %v807_v30 = vpack.c.bf16 %v788_v23, %v787_v26  ;;  %v793_v45 = vmax.f32 %v770_v59, 0.0  ;;  %v762_v46 = vadd.f32 %v1510_v10, %v566_v24  ;;  %v1164_v10 = vcombine.high %v800_v8, %v800_v8  ;;  %v846_v26 = vpop.permute.xlu1 %845 }
 0x101   : > { %905 = vmatprep.subr.bf16.mxu0 %v1315_v33  ;;  %v1221_v27 = vpop.f32.mrf.mxu0 }
 0x102   : > { %v810_v1 = vpack.c.bf16 %v793_v45, %v793_v45  ;;  %v791_v49 = vmax.f32 %v762_v46, 0.0  ;;  %v841_v24 = vpop.permute.xlu0 %840 }
 0x103   : > { %v569_v47 = vpop.f32.mrf.mxu0 }
 0x104   : > { %906 = vmatpush1.bf16.msra.mxu0 %v807_v30  ;;  %v765_v53 = vadd.f32 %v764_v63, %v569_v47  ;;  %v901_v44 = vsel %vm899_vm15, %v810_v1, 0  ;;  %v831_v34 = vpop.permute.xlu1 %830 }
 0x105   : > { %907 = vmatprep.subr.bf16.mxu0 %v1315_v33 }
 0x106   : > { %v792_v3 = vmax.f32 %v765_v53, 0.0  ;;  %v836_v29 = vpop.permute.xlu0 %835 }
 0x108   : > { %908 = vmatpush1.bf16.msra.mxu0 %v806_v35  ;;  %v809_v4 = vpack.c.bf16 %v792_v3, %v791_v49  ;;  %v821_v52 = vpop.permute.xlu1 %820 }
 0x109   : > { %909 = vmatprep.subr.bf16.mxu0 %v1315_v33 }
 0x10a   : > { %v826_v42 = vpop.permute.xlu0 %825 }
 0x10c   : > { %910 = vmatpush1.bf16.msra.mxu0 %v805_v41  ;;  %v983_v43 = vpop.permute.xlu1 %982 }
 0x10d   : > { %911 = vmatprep.subr.bf16.mxu0 %v1315_v33 }
 0x110   : > { %912 = vmatpush1.bf16.msra.mxu0 %v804_v60 }
 0x111   : > { %913 = vmatprep.subr.bf16.mxu0 %v1315_v33 }
 0x114   : > { %914 = vmatpush1.bf16.msra.mxu0 %v803_v57 }
 0x115   : > { %915 = vmatprep.subr.bf16.mxu0 %v1315_v33 }
 0x118   : > { %916 = vmatpush1.bf16.msra.mxu0 %v802_v51  ;;  %v974_v51 = vld [vmem:[%s1568_s6] sm:$0x3] }
 0x119   : > { %917 = vmatprep.subr.bf16.mxu0 %v1315_v33 }
 0x11c   : > { %918 = vmatpush1.bf16.msra.mxu0 %v801_v2 }
 0x11d   : > { %931 = vmatprep.subr.bf16.mxu0 %v1315_v33 }
 0x120   : > { %932 = vmatpush2.bf16.msra.mxu0 %v901_v44 }
 0x121   : > { %933 = vmatprep.subr.bf16.mxu0 %v1315_v33  ;;  %v1297_v33 = vld [vmem:[%s1566_s4 + $0x24] ss:$8 sps:$4 sm:$0xff]  }
 0x124   : > { %934 = vmatpush2.bf16.msra.mxu0 %v809_v4 }
 0x127   : > { %936 = vmatmul.mubr.bf16.vlgmr.msra.gmra.mxu0 %v1291_v5 }
 0x128   : > { %1166 = vmatprep.mubr.msk.bf16.mxu0 %vm886_vm14, %v1294_v6 }
 0x12f   : > { %944 = vmatmul.mubr.bf16.gmra.mxu0 %v1296_v7 }
 0x130   : > { %1167 = vmatprep.mubr.msk.bf16.mxu0 %vm886_vm14, %v1297_v33 }
 0x137   : > { %952 = vmatmul.mubr.bf16.gmra.mxu0 %v1299_v9 }
 0x138   : > { %1168 = vmatprep.mubr.msk.bf16.mxu0 %vm886_vm14, %v1164_v10 }
 0x13f   : > { %960 = vmatmul.mubr.bf16.gmra.mxu0 %v1163_v11 }
 0x1e7   : > { %v937_v13 = vpop.f32.mrf.mxu0 }
 0x1e8   : > { %v938_v54 = vadd.f32 %v937_v13, %v821_v52 }
 0x1e9   : > { %v939_v14 = vpop.f32.mrf.mxu0 }
 0x1ea   : > { %v967_v62 = vmax.f32 %v938_v54, 0.0 }
 0x1eb   : > { %v940_v15 = vpop.f32.mrf.mxu0 }
 0x1ec   : > { %v941_v48 = vadd.f32 %v940_v15, %v826_v42 }
 0x1ed   : > { %v942_v16 = vpop.f32.mrf.mxu0 }
 0x1ee   : > { %v968_v57 = vmax.f32 %v941_v48, 0.0 }
 0x1ef   : > { %v945_v17 = vpop.f32.mrf.mxu0 }
 0x1f0   : > { %v946_v58 = vadd.f32 %v945_v17, %v831_v34  ;;  %v975_v45 = vpack.c.bf16 %v968_v57, %v967_v62 }
 0x1f1   : > { %v947_v18 = vpop.f32.mrf.mxu0 }
 0x1f2   : > { %v969_v50 = vmax.f32 %v946_v58, 0.0 }
 0x1f3   : > { %v948_v19 = vpop.f32.mrf.mxu0 }
 0x1f4   : > { %v949_v39 = vadd.f32 %v948_v19, %v836_v29 }
 0x1f5   : > { %v950_v21 = vpop.f32.mrf.mxu0 }
 0x1f6   : > { %v970_v55 = vmax.f32 %v949_v39, 0.0 }
 0x1f7   : > { %v953_v22 = vpop.f32.mrf.mxu0 }
 0x1f8   : > { %v954_v36 = vadd.f32 %v953_v22, %v841_v24  ;;  %v976_v61 = vpack.c.bf16 %v970_v55, %v969_v50 }
 0x1f9   : > { %v955_v23 = vpop.f32.mrf.mxu0 }
 0x1fa   : > { %v971_v60 = vmax.f32 %v954_v36, 0.0 }
 0x1fb   : > { %v956_v25 = vpop.f32.mrf.mxu0 }
 0x1fc   : > { %v957_v31 = vadd.f32 %v956_v25, %v846_v26 }
 0x1fd   : > { %v958_v27 = vpop.f32.mrf.mxu0 }
 0x1fe   : > { %v972_v40 = vmax.f32 %v957_v31, 0.0 }
 0x1ff   : > { %v961_v28 = vpop.f32.mrf.mxu0 }
 0x200   : > { %v962_v30 = vadd.f32 %v961_v28, %v851_v20  ;;  %v977_v59 = vpack.c.bf16 %v972_v40, %v971_v60 }
 0x201   : > { %v963_v32 = vpop.f32.mrf.mxu0 }
 0x202   : > { %v973_v35 = vmax.f32 %v962_v30, 0.0 }
 0x203   : > { %v964_v37 = vpop.f32.mrf.mxu0 }
 0x204   : > { %v978_v38 = vpack.c.bf16 %v973_v35, %v973_v35 }
 0x205   : > { %v965_v41 = vpop.f32.mrf.mxu0 }
 0x206   : > { %v991_v56 = vsel %vm989_vm1, %v978_v38, 0 }
 0x207   : > { %1245 = vmatpush3.bf16.msra.mxu1 %v991_v56 }
 0x208   : > { %1246 = vmatprep.subr.bf16.mxu1 %v1316_v12 }
 0x20b   : > { %1247 = vmatpush3.bf16.msra.mxu1 %v977_v59 }
 0x20c   : > { %1248 = vmatprep.subr.bf16.mxu1 %v1316_v12 }
 0x20f   : > { %1249 = vmatpush3.bf16.msra.mxu1 %v976_v61 }
 0x210   : > { %1250 = vmatprep.subr.bf16.mxu1 %v1316_v12 }
 0x213   : > { %1251 = vmatpush3.bf16.msra.mxu1 %v975_v45 }
 0x216   : > { %1253 = vmatmul.mubr.msk.bf16.vlgmr.msra.gmra.mxu1 %vm985_vm2, %v974_v51 }
 0x2d6   : > { %v1027_v47 = vpop.f32.mrf.mxu1 }
 0x2d7   : > { %v1028_v63 = vadd.f32 %v1027_v47, %v983_v43 }
 0x2d8   : > { %v1254_v0 = vpop.f32.mrf.mxu1 }
 0x2d9   : > { %v1170_v1 = vmul.f32 -1.442695, %v1028_v63 }
 0x2da   : > { %v1030_v2 = vpop.f32.mrf.mxu1 }
 0x2db   : > { %1302 = vpow2.f32 %v1170_v1 }
 0x2dc   : > { %v1255_v46 = vpop.f32.mrf.mxu1 }
 0x2e8   : > { %v1303_v53 = vpop.eup %1302 }
 0x2e9   : > { %v1036_v44 = vadd.f32 1.0, %v1303_v53 }
 0x2eb   : > { %1304 = vrcp.f32 %v1036_v44 }
 0x2f8   : > { %v1305_v49 = vpop.eup %1304 }
 0x2f9   : > { %1039 = vst [vmem:[%s317_s13] sm:$0xf] %v1305_v49 }
 0x2fa PF: > { %s18_s27 = sadd.s32 1, %s1312_s27  }
 0x2fb   : > { %p15_p4 = scmp.ge.s32.totalorder %s18_s27, 4  }
 0x2fd   :  { %17 = sbr.rel (!%p15_p4) target bundleno = 1 (0x1), region = 85 }

</bundles_post_ra>
